<compile_context>
chip_gen: v7x
topology: tpu7x:2x2x1
jax: 0.10.0
libtpu: 0.0.40
codegen_flags: <defaults>
</compile_context>

<pallas_src>
import functools

import jax
import jax.numpy as jnp
from jax.experimental import pallas as pl
from jax.experimental.pallas import tpu as pltpu

_LANE = 128


def _focal_kernel(*refs, gamma, n_valid, has_alpha, alpha_len, need_mask):
    """One (n, l) grid step.

    refs (has_alpha=True):  x_ref (1,C,TILE_L), t_ref (1,1,TILE_L) int8/int32,
                            a_ref (alpha_len,) f32 in SMEM, out_ref (1,1,128) f32
    refs (has_alpha=False): x_ref, t_ref, out_ref
    """
    if has_alpha:
        x_ref, t_ref, a_ref, out_ref = refs
    else:
        x_ref, t_ref, out_ref = refs
        a_ref = None

    l_idx = pl.program_id(1)

    x = x_ref[0].astype(jnp.float32)            # (C, TILE_L); cast in-VMEM
    t = t_ref[0].astype(jnp.int32)              # (1, TILE_L); int8 -> int32 in-VMEM

    c, tl = x.shape

    # log-softmax over the class (sublane) axis, fused with the one-hot gather:
    # logpt = z[target] - lse   (no materialized logp = z - lse over all classes).
    m = jnp.max(x, axis=0, keepdims=True)       # (1, TILE_L)
    z = x - m                                   # (C, TILE_L)
    lse = jnp.log(jnp.sum(jnp.exp(z), axis=0, keepdims=True))   # (1, TILE_L)

    cls = jax.lax.broadcasted_iota(jnp.int32, (c, tl), dimension=0)
    onehot = cls == t                           # (C, TILE_L)
    zt = jnp.sum(jnp.where(onehot, z, 0.0), axis=0, keepdims=True)   # (1, TILE_L)
    logpt = zt - lse                            # (1, TILE_L)
    pt = jnp.exp(logpt)                         # detach() irrelevant for forward

    if has_alpha:
        # alpha.gather(0, target) via a short select chain over SMEM scalars.
        at = jnp.zeros_like(logpt)
        for ci in range(alpha_len):
            at = jnp.where(t == ci, a_ref[ci], at)
        logpt = logpt * at

    # (1 - pt) ** gamma, specialized so common gammas stay off the EUP.
    g = float(gamma)
    if g == 0.0:
        loss = -logpt
    else:
        omp = 1.0 - pt
        if g.is_integer() and 0.0 < g <= 4.0:
            focal = omp
            for _ in range(int(g) - 1):
                focal = focal * omp
        else:
            focal = omp ** g
        loss = -focal * logpt                   # (1, TILE_L)

    out_lane = jax.lax.broadcasted_iota(jnp.int32, (1, 1, _LANE), dimension=2)

    def _write(total):
        out_ref[...] = jnp.where(out_lane == 0, total, 0.0)

    if not need_mask:
        # TILE_L divides the (unpadded) lane extent: no mask anywhere.
        _write(jnp.sum(loss))
    else:
        # Only the boundary tile carries padded columns; interior tiles skip the mask.
        last = pl.num_programs(1) - 1

        @pl.when(l_idx != last)
        def _():
            _write(jnp.sum(loss))

        @pl.when(l_idx == last)
        def _():
            lane = jax.lax.broadcasted_iota(jnp.int32, (1, tl), dimension=1)
            valid = (l_idx * tl + lane) < n_valid
            _write(jnp.sum(jnp.where(valid, loss, 0.0)))


def focal_loss(x, target, gamma=0.0, alpha=None, *,
               vmem_budget_bytes=32 * 1024 * 1024):
    """Pallas implementation of FocalLoss.forward.

    x      : logits, NCHW (N, C, H, W) (or already 2-D (rows, C)); native dtype kept.
    target : integer class indices with N*H*W (or rows) elements.
    alpha  : None, a scalar (-> [alpha, 1-alpha]), or a length-C list/array.
    """
    if x.ndim > 2:
        n, c = x.shape[0], x.shape[1]
        l = 1
        for d in x.shape[2:]:
            l *= d
        x3 = x.reshape(n, c, l)                                  # free: NCHW contiguous
        tgt = target.reshape(n, 1, l)
    else:
        # TODO(synk): the 2-D (rows, C) path pays one XLA transpose (extra HBM round
        # trip); a dedicated rows-on-sublanes kernel variant would remove it.
        rows, c = x.shape
        n, l = 1, rows
        x3 = jnp.transpose(x, (1, 0)).reshape(1, c, rows)
        tgt = target.reshape(1, 1, rows)

    rows_total = n * l

    # Shrink the target HBM stream: 1 B/row instead of 4 B/row when C <= 127.
    t_dtype = jnp.int8 if c <= 127 else jnp.int32
    t3 = tgt.astype(t_dtype)

    if alpha is None:
        has_alpha = False
        alpha_arr = None
        alpha_len = 0
    else:
        if isinstance(alpha, (float, int)):
            alpha_arr = jnp.asarray([alpha, 1.0 - alpha], dtype=jnp.float32)
        else:
            alpha_arr = jnp.asarray(alpha, dtype=jnp.float32).reshape(-1)
        has_alpha = True
        alpha_len = int(alpha_arr.shape[0])

    # Lane tile sized from an explicit VMEM working-set budget that accounts for the
    # real per-step footprint (double-buffered inputs, sublane padding of C to 8, and
    # the live f32 (C, TILE_L) temporaries of the fused log-softmax / gather chain).
    in_itemsize = jnp.dtype(x3.dtype).itemsize
    c_pad = ((c + 7) // 8) * 8
    per_lane = (2 * c_pad * in_itemsize      # double-buffered logits block
                + 2 * 32                      # double-buffered target block (sublane-padded)
                + 5 * c_pad * 4               # live f32 (C, TILE_L) temporaries
                + 64)                         # (1, TILE_L) row temporaries
    lp128 = ((l + _LANE - 1) // _LANE) * _LANE
    tile_l = max(_LANE, (vmem_budget_bytes // per_lane) // _LANE * _LANE)
    tile_l = min(tile_l, lp128)
    num_l = pl.cdiv(lp128, tile_l)

    # Pad the lane axis so tile_l divides it exactly: every block is a full DMA (no
    # clamped partial block reading stale VMEM) and only the last tile needs a mask.
    lp = num_l * tile_l
    pad = lp - l
    if pad:
        x3 = jnp.pad(x3, ((0, 0), (0, 0), (0, pad)))
        t3 = jnp.pad(t3, ((0, 0), (0, 0), (0, pad)))

    in_specs = [
        pl.BlockSpec((1, c, tile_l), lambda i, j: (i, 0, j)),   # logits tile
        pl.BlockSpec((1, 1, tile_l), lambda i, j: (i, 0, j)),   # target tile
    ]
    args = [x3, t3]
    if has_alpha:
        # Tiny per-class weights live in SMEM (out of the tiled-input pipeline).
        in_specs.append(pl.BlockSpec(memory_space=pltpu.MemorySpace.SMEM))
        args.append(alpha_arr)

    kernel = functools.partial(
        _focal_kernel, gamma=float(gamma), n_valid=l, has_alpha=has_alpha,
        alpha_len=alpha_len, need_mask=pad > 0)

    # NOTE(v7x): "parallel" axes are the standard megacore-sharding mechanism; if
    # profiling shows only one TensorCore active, switch num_l to pltpu.CORE_PARALLEL.
    out = pl.pallas_call(
        kernel,
        out_shape=jax.ShapeDtypeStruct((n, 1, num_l * _LANE), jnp.float32),
        grid_spec=pltpu.PrefetchScalarGridSpec(
            num_scalar_prefetch=0,
            grid=(n, num_l),
            in_specs=in_specs,
            out_specs=pl.BlockSpec((1, 1, _LANE), lambda i, j: (i, 0, j)),
        ),
        compiler_params=pltpu.CompilerParams(
            dimension_semantics=("parallel", "parallel"),
            vmem_limit_bytes=48 * 1024 * 1024,
        ),
    )(*args)

    # loss.mean().view(-1) -> shape (1,)
    total = jnp.sum(out)
    return (total / jnp.float32(rows_total)).reshape(-1)


def _focal_loss_ref(x, target, gamma=0.0, alpha=None):
    """Pure-JAX reference mirroring the PyTorch forward."""
    if x.ndim > 2:
        n, c = x.shape[0], x.shape[1]
        x = jnp.transpose(x.reshape(n, c, -1), (0, 2, 1)).reshape(-1, c)
    t = target.reshape(-1).astype(jnp.int32)
    logp = jax.nn.log_softmax(x.astype(jnp.float32), axis=1)
    logpt = jnp.take_along_axis(logp, t[:, None], axis=1)[:, 0]
    pt = jnp.exp(logpt)
    if alpha is not None:
        if isinstance(alpha, (float, int)):
            alpha = [alpha, 1.0 - alpha]
        at = jnp.asarray(alpha, dtype=jnp.float32)[t]
        logpt = logpt * at
    loss = -1.0 * (1.0 - pt) ** float(gamma) * logpt
    return jnp.mean(loss).reshape(-1)


if __name__ == "__main__":
    key = jax.random.PRNGKey(0)
    kx, kt = jax.random.split(key)

    # Primary case: NCHW logits, integer gamma, per-class alpha.
    N, C, H, W = 2, 4, 16, 16
    gamma = 2.0
    alpha = [0.1, 0.2, 0.3, 0.4]

    x = jax.random.normal(kx, (N, C, H, W), dtype=jnp.float32)
    target = jax.random.randint(kt, (N, H, W), 0, C, dtype=jnp.int32)

    out = focal_loss(x, target, gamma=gamma, alpha=alpha)
    out = jax.block_until_ready(out)
    ref = _focal_loss_ref(x, target, gamma=gamma, alpha=alpha)
    assert out.shape == (1,)
    assert jnp.allclose(out, ref, rtol=1e-5, atol=1e-6), (out, ref)

    # Secondary case: non-128-divisible spatial size (pad + gated boundary mask),
    # gamma=0 / no alpha path (alpha input dropped entirely).
    H2, W2 = 10, 10
    x2 = jax.random.normal(kx, (N, C, H2, W2), dtype=jnp.float32)
    t2 = jax.random.randint(kt, (N, H2, W2), 0, C, dtype=jnp.int32)
    out2 = jax.block_until_ready(focal_loss(x2, t2, gamma=0.0, alpha=None))
    ref2 = _focal_loss_ref(x2, t2, gamma=0.0, alpha=None)
    assert jnp.allclose(out2, ref2, rtol=1e-5, atol=1e-6), (out2, ref2)

    # Third case: 2-D (rows, C) input, scalar alpha, integer gamma (SMEM alpha path).
    R, C2 = 64, 2
    x3 = jax.random.normal(kx, (R, C2), dtype=jnp.float32)
    t3 = jax.random.randint(kt, (R,), 0, C2, dtype=jnp.int32)
    out3 = jax.block_until_ready(focal_loss(x3, t3, gamma=1.0, alpha=0.25))
    ref3 = _focal_loss_ref(x3, t3, gamma=1.0, alpha=0.25)
    assert jnp.allclose(out3, ref3, rtol=1e-5, atol=1e-6), (out3, ref3)

    print("KERNEL_OK")
</pallas_src>

<mosaic_0001>
module attributes {stable_mosaic.version = 11 : i64} {
  func.func @_focal_kernel(%arg0: i32, %arg1: i32, %arg2: memref<1x4x256xf32, #tpu.memory_space<vmem>>, %arg3: memref<1x1x256xi8, #tpu.memory_space<vmem>>, %arg4: memref<4xf32, #tpu.memory_space<smem>>, %arg5: memref<1x1x128xf32, #tpu.memory_space<vmem>>) attributes {dimension_semantics = [#tpu.dimension_semantics<parallel>, #tpu.dimension_semantics<parallel>], iteration_bounds = array<i64: 2, 1>, scalar_prefetch = 0 : i64, scratch_operands = 0 : i64, tpu.core_type = #tpu.core_type<tc>, window_params = [{transform_indices = @transform_0, window_bounds = array<i64: 1, 4, 256>}, {transform_indices = @transform_1, window_bounds = array<i64: 1, 1, 256>}, {transform_indices = @transform_2, window_bounds = array<i64: 4>}, {transform_indices = @transform_3, window_bounds = array<i64: 1, 1, 128>}]} {
    %c0 = arith.constant 0 : index
    %c0_0 = arith.constant 0 : index
    %c0_1 = arith.constant 0 : index
    %0 = vector.load %arg2[%c0, %c0_0, %c0_1] : memref<1x4x256xf32, #tpu.memory_space<vmem>>, vector<1x4x256xf32>
    %1 = vector.shape_cast %0 : vector<1x4x256xf32> to vector<4x256xf32>
    %c0_2 = arith.constant 0 : index
    %c0_3 = arith.constant 0 : index
    %c0_4 = arith.constant 0 : index
    %2 = vector.load %arg3[%c0_2, %c0_3, %c0_4] : memref<1x1x256xi8, #tpu.memory_space<vmem>>, vector<1x1x256xi8>
    %3 = vector.shape_cast %2 : vector<1x1x256xi8> to vector<1x256xi8>
    %4 = arith.extsi %3 : vector<1x256xi8> to vector<1x256xi32>
    %cst = arith.constant dense<0xFF800000> : vector<256xf32>
    %5 = vector.multi_reduction <maximumf>, %1, %cst [0] : vector<4x256xf32> to vector<256xf32>
    %6 = vector.shape_cast %5 : vector<256xf32> to vector<1x256xf32>
    %7 = vector.broadcast %6 : vector<1x256xf32> to vector<4x256xf32>
    %8 = arith.subf %1, %7 : vector<4x256xf32>
    %9 = math.exp %8 : vector<4x256xf32>
    %cst_5 = arith.constant dense<0.000000e+00> : vector<256xf32>
    %10 = vector.multi_reduction <add>, %9, %cst_5 [0] : vector<4x256xf32> to vector<256xf32>
    %11 = vector.shape_cast %10 : vector<256xf32> to vector<1x256xf32>
    %12 = math.log %11 : vector<1x256xf32>
    %13 = tpu.iota {dimensions = array<i32: 0>} : vector<4x256xi32>
    %14 = vector.broadcast %4 : vector<1x256xi32> to vector<4x256xi32>
    %15 = arith.cmpi eq, %13, %14 : vector<4x256xi32>
    %cst_6 = arith.constant 0.000000e+00 : f32
    %16 = vector.broadcast %cst_6 : f32 to vector<4x256xf32>
    %17 = arith.select %15, %8, %16 : vector<4x256xi1>, vector<4x256xf32>
    %cst_7 = arith.constant dense<0.000000e+00> : vector<256xf32>
    %18 = vector.multi_reduction <add>, %17, %cst_7 [0] : vector<4x256xf32> to vector<256xf32>
    %19 = vector.shape_cast %18 : vector<256xf32> to vector<1x256xf32>
    %20 = arith.subf %19, %12 : vector<1x256xf32>
    %21 = math.exp %20 : vector<1x256xf32>
    %cst_8 = arith.constant 0.000000e+00 : f32
    %22 = vector.broadcast %cst_8 : f32 to vector<1x256xf32>
    %c0_i32 = arith.constant 0 : i32
    %23 = vector.broadcast %c0_i32 : i32 to vector<1x256xi32>
    %24 = arith.cmpi eq, %4, %23 : vector<1x256xi32>
    %c0_9 = arith.constant 0 : index
    %25 = memref.load %arg4[%c0_9] : memref<4xf32, #tpu.memory_space<smem>>
    %26 = vector.broadcast %25 : f32 to vector<1x256xf32>
    %27 = arith.select %24, %26, %22 : vector<1x256xi1>, vector<1x256xf32>
    %c1_i32 = arith.constant 1 : i32
    %28 = vector.broadcast %c1_i32 : i32 to vector<1x256xi32>
    %29 = arith.cmpi eq, %4, %28 : vector<1x256xi32>
    %c1 = arith.constant 1 : index
    %30 = memref.load %arg4[%c1] : memref<4xf32, #tpu.memory_space<smem>>
    %31 = vector.broadcast %30 : f32 to vector<1x256xf32>
    %32 = arith.select %29, %31, %27 : vector<1x256xi1>, vector<1x256xf32>
    %c2_i32 = arith.constant 2 : i32
    %33 = vector.broadcast %c2_i32 : i32 to vector<1x256xi32>
    %34 = arith.cmpi eq, %4, %33 : vector<1x256xi32>
    %c2 = arith.constant 2 : index
    %35 = memref.load %arg4[%c2] : memref<4xf32, #tpu.memory_space<smem>>
    %36 = vector.broadcast %35 : f32 to vector<1x256xf32>
    %37 = arith.select %34, %36, %32 : vector<1x256xi1>, vector<1x256xf32>
    %c3_i32 = arith.constant 3 : i32
    %38 = vector.broadcast %c3_i32 : i32 to vector<1x256xi32>
    %39 = arith.cmpi eq, %4, %38 : vector<1x256xi32>
    %c3 = arith.constant 3 : index
    %40 = memref.load %arg4[%c3] : memref<4xf32, #tpu.memory_space<smem>>
    %41 = vector.broadcast %40 : f32 to vector<1x256xf32>
    %42 = arith.select %39, %41, %37 : vector<1x256xi1>, vector<1x256xf32>
    %43 = arith.mulf %20, %42 : vector<1x256xf32>
    %cst_10 = arith.constant 1.000000e+00 : f32
    %44 = vector.broadcast %cst_10 : f32 to vector<1x256xf32>
    %45 = arith.subf %44, %21 : vector<1x256xf32>
    %46 = arith.mulf %45, %45 : vector<1x256xf32>
    %cst_11 = arith.constant 0.000000e+00 : f32
    %47 = vector.broadcast %cst_11 : f32 to vector<1x256xf32>
    %48 = arith.subf %47, %46 : vector<1x256xf32>
    %49 = arith.mulf %48, %43 : vector<1x256xf32>
    %50 = tpu.iota {dimensions = array<i32: 2>} : vector<1x1x128xi32>
    %51 = vector.shape_cast %49 : vector<1x256xf32> to vector<1x1x256xf32>
    %cst_12 = arith.constant dense<0.000000e+00> : vector<1xf32>
    %52 = vector.multi_reduction <add>, %51, %cst_12 [1, 2] : vector<1x1x256xf32> to vector<1xf32>
    %53 = vector.shape_cast %52 : vector<1xf32> to vector<1x1x1xf32>
    %54 = vector.extract %53[0, 0, 0] : f32 from vector<1x1x1xf32>
    %c0_i32_13 = arith.constant 0 : i32
    %55 = vector.broadcast %c0_i32_13 : i32 to vector<1x1x128xi32>
    %56 = arith.cmpi eq, %50, %55 : vector<1x1x128xi32>
    %cst_14 = arith.constant 0.000000e+00 : f32
    %57 = vector.broadcast %54 : f32 to vector<1x1x128xf32>
    %58 = vector.broadcast %cst_14 : f32 to vector<1x1x128xf32>
    %59 = arith.select %56, %57, %58 : vector<1x1x128xi1>, vector<1x1x128xf32>
    %c0_15 = arith.constant 0 : index
    %c0_16 = arith.constant 0 : index
    %c0_17 = arith.constant 0 : index
    %60 = vector.load %arg5[%c0_15, %c0_16, %c0_17] : memref<1x1x128xf32, #tpu.memory_space<vmem>>, vector<1x1x128xf32>
    tpu.vector_store %arg5[%c0_15, %c0_16, %c0_17], %59 {strides = array<i32>} : memref<1x1x128xf32, #tpu.memory_space<vmem>>, vector<1x1x128xf32>,
    return
  }
  func.func @transform_0(%arg0: i32, %arg1: i32) -> (i32, i32, i32) {
    %c0_i32 = arith.constant 0 : i32
    %c0_i32_0 = arith.constant 0 : i32
    return %arg0, %c0_i32, %arg1 : i32, i32, i32
  }
  func.func @transform_1(%arg0: i32, %arg1: i32) -> (i32, i32, i32) {
    %c0_i32 = arith.constant 0 : i32
    %c0_i32_0 = arith.constant 0 : i32
    return %arg0, %c0_i32, %arg1 : i32, i32, i32
  }
  func.func @transform_2(%arg0: i32, %arg1: i32) -> i32 {
    %c0_i32 = arith.constant 0 : i32
    %c0_i32_0 = arith.constant 0 : i32
    return %c0_i32 : i32
  }
  func.func @transform_3(%arg0: i32, %arg1: i32) -> (i32, i32, i32) {
    %c0_i32 = arith.constant 0 : i32
    %c0_i32_0 = arith.constant 0 : i32
    return %arg0, %c0_i32, %arg1 : i32, i32, i32
  }
}

</mosaic_0001>

<bundles_post_ra>
// kernel: tpu_custom_call.1
= control target key start
LH: loop header
LB: loop body
LE: loop exit
PB: predicated region body
PF: predicated region fallthrough
CT: control target
= control target key end

     0   :  { %8 = vsyncpa [#allocation3], 0  ;;  %s1019_s0 = inlined_call_operand.hbm [shape: f32[2,4,256], index: 0, kind: input, shape index: {}]   ;;  %s1020_s1 = inlined_call_operand.vmem [shape: s8[2,1,256], index: 1, kind: input, shape index: {}]   ;;  %s1021_s2 = inlined_call_operand.vmem [shape: f32[4], index: 2, kind: input, shape index: {}]   ;;  %s1022_s3 = inlined_call_operand.hbm [shape: f32[2,1,128], index: 3, kind: output, shape index: {}]  }
   0x1   :  { %10 = vsyncpa [#allocation3 + $0x1], 0 }
   0x2   :  { %11 = vsyncpa [#allocation5], 0 }
   0x3   :  { %12 = vsyncpa [#allocation4], 0 }
   0x4   :  { %14 = vsyncpa [#allocation4 + $0x1], 0  ;;  %s782_s12 = smov 0   ;;  %s784_s13 = smov 0  }
   0x5   :  { %s786_s14 = smov 0   ;;  %s788_s15 = smov 0  }
   0x6   :  { %s790_s16 = smov 0   ;;  %s792_s17 = smov 0  }
   0x7 LB: > { %s521_s18 = sadd.s32 4294967295, %s757_s17   ;;  %s522_s19 = sadd.s32 4294967294, %s757_s17   ;;  %s757_s17 = sphi %s792_s17, %s20_s17   ;;  %s753_s16 = sphi %s790_s16, %s1044_s16   ;;  %s749_s15 = sphi %s788_s15, %s1043_s15   ;;  %s745_s14 = sphi %s786_s14, %s1042_s14   ;;  %s741_s13 = sphi %s784_s13, %s1041_s13   ;;  %s737_s12 = sphi %s782_s12, %s1040_s12  }
   0x8   : > { %p54_p0 = scmp.ne.s32.totalorder %s741_s13, %s737_s12  ;;  %p816_p1 = scmp.eq.s32.totalorder %s521_s18, 0 }
   0x9   : > { %p820_p2 = scmp.eq.s32.totalorder %s521_s18, 1  ;;  %p135_p3 = scmp.eq.s32.totalorder %s522_s19, 1 }
   0xa   : > { %s1027_s20 = scalar_select %p816_p1, 1, 0 }
   0xb   : > { %p826_p4 = por %p816_p1, %p54_p0  ;;  %p523_p5 = scmp.ge.s32.totalorder %s757_s17, 1 }
   0xc   : > { %p831_p6 = por %p135_p3, %p54_p0  ;;  %p142_p7 = scmp.lt.s32.totalorder %s757_s17, 3 }
   0xd   : > { %s1029_s22 = scalar_select %p826_p4, 1, 0 }
   0xe   : > { %s1030_s23 = scalar_select %p831_p6, 1, 0 }
   0xf   : > { %s155_s26 = sshll.u32 %s1021_s2, 4  ;;  %p839_p8 = pnand %p523_p5, %p142_p7  ;;  %s156_s26 = int_to_ptr.vmem [resolvable:$true] %s155_s26 }
  0x10   : > { %s32_s29 = sadd.s32 1, %s753_s16  ;;  %s41_s30 = sadd.s32 1, %s745_s14 }
  0x11   : > { %p550_p10 = pneg %p839_p8  ;;  %p34_p12 = scmp.ge.s32.totalorder %s32_s29, 2 }
  0x12   : > { %s626_s4 = scalar_lea.vmem %s156_s26, 16  ;;  %p634_p7 = scmp.lt.s32.totalorder %s156_s26, %s156_s26 }
  0x13   : > { %p848_p11 = pnand %p550_p10, %p816_p1  ;;  %p627_p13 = scmp.ne.s32.totalorder %s156_s26, %s626_s4 }
  0x14   : > { %p635_p6 = scmp.lt.s32.totalorder %s626_s4, %s626_s4 }
  0x15   : > { %p628_p0 = pneg %p848_p11 }
  0x16   : > { %p636_p9 = por %p635_p6, %p634_p7 }
  0x17   : > { %p629_p3 = pnand %p628_p0, %p627_p13 }
  0x19   : > { %p630_p5 = pneg %p629_p3 }
  0x1b   : > { %p637_p4 = pnand %p636_p9, %p630_p5 }
  0x1d   : > { %640 = shalt.err (!%p637_p4)
}
  0x1e   : > { %s759_s5 = smov [#allocation6]   ;;  %s1046_s29 = smov (%p34_p12, %s32_s29), 0 }
  0x1f   : > { %553 = dma.vmem_to_smem (!%p848_p11), %s156_s26, 16, %s759_s5, [#allocation5]  }
  0x20   : > { %p48_p10 = scmp.ne.s32.totalorder %s745_s14, %s741_s13  ;;  %p49_p6 = scmp.eq.s32.totalorder %s757_s17, 0 }
  0x21   : > { %s36_s6 = ssub.s32 %s753_s16, %s1046_s29  ;;  %p563_p4 = scmp.lt.s32.totalorder %s757_s17, 2 }
  0x22   : > { %p39_p9 = scmp.eq.s32.totalorder %s36_s6, 0  ;;  %p50_p13 = por %p49_p6, %p48_p10 }
  0x23   : > { %p868_p0 = por %p820_p2, %p48_p10  ;;  %s166_s8 = sand.u32 1, %s745_s14  }
  0x24   : > { %s874_s9 = scalar_select %p39_p9, %s745_s14, %s41_s30  }
  0x25   : > { %s1033_s7 = scalar_select %p868_p0, 1, 0 }
  0x26   : > { %s526_s10 = sshll.u32 %s166_s8, 3  ;;  %s539_s11 = sshll.u32 %s753_s16, 7 }
  0x27   : > { %s880_s24 = scalar_lea.hbm %s1019_s0, %s539_s11  ;;  %s170_s25 = scalar_lea.vmem [#allocation2], %s526_s10 }
  0x28   : > { %s180_s21 = sshll.u32 %s170_s25, 4  ;;  %p884_p2 = pnand %p563_p4, %p50_p13  ;;  %s882_s21 = int_to_ptr.vmem [resolvable:$true] %s180_s21 }
  0x29   : > { %s167_s28 = scalar_lea.sflag [#allocation3], %s166_s8  ;;  %s641_s30 = scalar_lea.hbm %s880_s24, 128 }
  0x2a   : > { %p642_p11 = scmp.ne.s32.totalorder %s880_s24, %s641_s30  ;;  %p643_p12 = pneg %p884_p2 }
  0x2b   : > { %s646_s6 = scalar_lea.hbm %s1019_s0, 256  ;;  %p647_p7 = scmp.lt.u32.totalorder %s880_s24, %s1019_s0 }
  0x2c   : > { %p644_p3 = pnand %p643_p12, %p642_p11  ;;  %p648_p10 = scmp.lt.u32.totalorder %s646_s6, %s641_s30 }
  0x2d   : > { %p650_p4 = scmp.lt.u32.totalorder %s641_s30, %s880_s24 }
  0x2e   : > { %p645_p5 = pneg %p644_p3  ;;  %p649_p6 = por %p648_p10, %p647_p7 }
  0x30   : > { %p651_p9 = por %p650_p4, %p649_p6 }
  0x32   : > { %p652_p13 = pnand %p651_p9, %p645_p5 }
  0x34   : > { %655 = shalt.err (!%p652_p13)
}
  0x35   : > { %s656_s8 = scalar_lea.vmem %s882_s21, 128  ;;  %s760_s18 = smov [#allocation2]  }
  0x36   : > { %p657_p11 = scmp.ne.s32.totalorder %s882_s21, %s656_s8  ;;  %s661_s19 = sshll.u32 %s760_s18, 4  ;;  %s662_s19 = int_to_ptr.vmem [resolvable:$false] %s661_s19 }
  0x37   : > { %s663_s25 = scalar_lea.vmem %s662_s19, 256  ;;  %p664_p1 = scmp.lt.s32.totalorder %s882_s21, %s662_s19 }
  0x38   : > { %p659_p3 = pnand %p657_p11, %p643_p12  ;;  %p665_p7 = scmp.lt.s32.totalorder %s663_s25, %s656_s8 }
  0x3a   : > { %p660_p0 = pneg %p659_p3  ;;  %p666_p10 = por %p665_p7, %p664_p1 }
  0x3c   : > { %p667_p6 = pnand %p666_p10, %p660_p0 }
  0x3e   : > { %670 = shalt.err (!%p667_p6)
}
  0x3f   : > { %557 = dma.hbm_to_vmem [thread:$0]  (!%p884_p2), %s880_s24, 128, %s882_s21, %s167_s28  }
  0x40   : > { %201 = sbr.rel (%p839_p8) target bundleno = 384 (0x180), region = 32  ;;  %s916_s30 = sand.u32 (!%p839_p8), 1, %s741_s13  }
  0x41   : > { %s530_s4 = sshll.u32 (!%p839_p8), %s916_s30, 3  ;;  %s204_s5 = scalar_lea.sflag (!%p839_p8), [#allocation3], %s916_s30 }
  0x42   : > { %s207_s6 = scalar_lea.vmem (!%p839_p8), [#allocation2], %s530_s4  ;;  %p1035_p1 = scmp.ne.s32.totalorder (!%p839_p8), %s1029_s22, 0 }
  0x47   : > { %724 = dma.done.wait (%p1035_p1), %s204_s5, 128  }
  0x48   : > { %726 = vsyncadd (%p1035_p1), %s204_s5, 4294967168  ;;  %p1036_p0 = scmp.ne.s32.totalorder %s1027_s20, 0 }
  0x4a   : > { %728 = dma.done.wait (%p1036_p0), [#allocation5], 16  }
  0x4b   : > { %730 = vsyncadd (%p1036_p0), [#allocation5], 4294967280 }
  0x4c   : > { %216 = sfence }
  0x4d   : > { %p244_p8 = scmp.lt.s32.totalorder %s749_s15, 1  ;;  %v252_v0 = vld [vmem:[%s207_s6] sm:$0xff]  ;;  %vm258_vm0 = vcmask 1043456   ;;  %v301_v9 = vlaneseq  ;;  %s347_s26 = sld [smem:[#allocation6]]  ;;  %vm385_vm7 = vcmask 1040384  }
  0x4e   : > { %v256_v1 = vcombine.high %v252_v0, %v252_v0  ;;  %v259_v2 = vsel %vm258_vm0, %v252_v0, -inf  ;;  %s533_s28 = sld [smem:[#allocation6 + $0x1]]  ;;  %s534_s10 = sld [smem:[#allocation6 + $0x2]] }
  0x4f   : > { %s245_s27 = scalar_select %p244_p8, %s749_s15, 1  ;;  %v260_v3 = vrot.slane %v259_v2, 4  ;;  %v936_v14 = vshrl.u32 %v301_v9, 7 }
  0x50   : > { %v266_v4 = vsel %vm258_vm0, %v256_v1, -inf  ;;  %s535_s11 = sld [smem:[#allocation6 + $0x3]]  ;;  %s536_s8 = sshll.u32 %s749_s15, 4 }
  0x51   : > { %v261_v5 = vmax.f32 %v259_v2, %v260_v3  ;;  %v267_v6 = vrot.slane %v266_v4, 4  ;;  %s532_s22 = sshll.u32 %s245_s27, 1  ;;  %v941_v20 = vsub.s32 0, %v936_v14  ;;  %v309_v22 = vsub.s32 4, %v936_v14  ;;  %s241_s18 = scalar_lea.vmem [#allocation7], %s916_s30 }
  0x52   : > { %s250_s21 = scalar_lea.vmem %s1020_s1, %s532_s22  ;;  %s416_s19 = sshll.u32 %s241_s18, 4  ;;  %s972_s19 = int_to_ptr.vmem [resolvable:$true] %s416_s19 }
  0x53   : > { %v262_v7 = vrot.slane %v261_v5, 2  ;;  %v268_v8 = vmax.f32 %v266_v4, %v267_v6  ;;  %v253_v15 = vld [vmem:[%s250_s21] sm:$0x3]  ;;  %s970_s6 = scalar_lea.hbm %s1022_s3, %s536_s8  ;;  %s403_s27 = scalar_lea.sflag [#allocation4], %s916_s30 }
  0x54   : > { %v938_v18 = vunpack.c.0.s8 %v253_v15  ;;  %s671_s22 = scalar_lea.vmem %s972_s19, 16  ;;  %p1037_p12 = scmp.ne.s32.totalorder %s1033_s7, 0 }
  0x55   : > { %v263_v10 = vmax.f32 %v261_v5, %v262_v7  ;;  %v269_v11 = vrot.slane %v268_v8, 2  ;;  %v352_v5 = vstv %s533_s28  ;;  %p672_p2 = scmp.ne.s32.totalorder %s972_s19, %s671_s22  ;;  %s761_s15 = smov [#allocation7]  }
  0x56   : > { %v306_v24 = vrot.slane %v938_v18, %v941_v20  ;;  %v310_v26 = vrot.slane %v938_v18, %v309_v22  ;;  %vm346_vm3 = vcmp.eq.s32.totalorder %v938_v18, 0  ;;  %vm350_vm4 = vcmp.eq.s32.totalorder %v938_v18, 1  ;;  %s675_s20 = sshll.u32 %s761_s15, 4  ;;  %s676_s20 = int_to_ptr.vmem [resolvable:$false] %s675_s20 }
  0x57   : > { %v264_v12 = vrot.slane %v263_v10, 1  ;;  %v270_v13 = vmax.f32 %v268_v8, %v269_v11  ;;  %v356_v8 = vstv %s534_s10  ;;  %vm354_vm5 = vcmp.eq.s32.totalorder %v938_v18, 2  ;;  %p673_p5 = pnand %p672_p2, %p1037_p12  ;;  %s677_s24 = scalar_lea.vmem %s676_s20, 32 }
  0x58   : > { %v314_v27 = vrot.slane %v306_v24, %v941_v20  ;;  %v318_v28 = vrot.slane %v310_v26, %v941_v20  ;;  %vm358_vm6 = vcmp.eq.s32.totalorder %v938_v18, 3  ;;  %p678_p9 = scmp.lt.s32.totalorder %s972_s19, %s676_s20  ;;  %p679_p13 = scmp.lt.s32.totalorder %s677_s24, %s671_s22 }
  0x59   : > { %v265_v16 = vmax.f32 %v263_v10, %v264_v12  ;;  %v271_v17 = vrot.slane %v270_v13, 1  ;;  %p674_p4 = pneg %p673_p5 }
  0x5a   : > { %vm319_vm1 = vcmp.eq.s32.totalorder %v936_v14, %v314_v27  ;;  %vm320_vm2 = vcmp.eq.s32.totalorder %v936_v14, %v318_v28  ;;  %p680_p11 = por %p679_p13, %p678_p9 }
  0x5b   : > { %v272_v19 = vmax.f32 %v270_v13, %v271_v17  ;;  %v360_v13 = vstv %s535_s11 }
  0x5c   : > { %p681_p3 = pnand %p680_p11, %p674_p4 }
  0x5d   : > { %v275_v21 = vcombine.low %v265_v16, %v272_v19 }
  0x5f   : > { %v277_v23 = vsub.f32 %v252_v0, %v275_v21  ;;  %v348_v0 = vstv %s347_s26 }
  0x60   : > { %v349_v4 = vsel %vm346_vm3, %v348_v0, 0.0 }
  0x61   : > { %v278_v25 = vmul.f32 1.442695, %v277_v23  ;;  %v322_v29 = vcombine.high %v277_v23, %v277_v23  ;;  %v324_v30 = vsel %vm319_vm1, %v277_v23, 0.0  ;;  %v353_v11 = vsel %vm350_vm4, %v352_v5, %v349_v4 }
  0x62   : > { %v326_v33 = vsel %vm258_vm0, %v324_v30, 0.0  ;;  %v357_v12 = vsel %vm354_vm5, %v356_v8, %v353_v11 }
  0x63   : > { %616 = vpow2.f32 %v278_v25  ;;  %v325_v31 = vsel %vm320_vm2, %v322_v29, 0.0  ;;  %v327_v39 = vrot.slane %v326_v33, 4  ;;  %v361_v15 = vsel %vm358_vm6, %v360_v13, %v357_v12 }
  0x64   : > { %v333_v37 = vsel %vm258_vm0, %v325_v31, 0.0  ;;  %v366_v16 = vrot.slane %v361_v15, %v941_v20  ;;  %v370_v19 = vrot.slane %v361_v15, %v309_v22 }
  0x65   : > { %v334_v42 = vrot.slane %v333_v37, 4  ;;  %v328_v45 = vadd.f32 %v327_v39, %v326_v33  ;;  %v384_v39 = vand.u32 127, %v301_v9 }
  0x67   : > { %v335_v48 = vadd.f32 %v334_v42, %v333_v37  ;;  %v329_v51 = vrot.slane %v328_v45, 2  ;;  %vm398_vm8 = vcmp.eq.s32.totalorder %v384_v39, 0 }
  0x69   : > { %v336_v54 = vrot.slane %v335_v48, 2  ;;  %v330_v56 = vadd.f32 %v329_v51, %v328_v45 }
  0x6b   : > { %v337_v57 = vadd.f32 %v336_v54, %v335_v48  ;;  %v331_v58 = vrot.slane %v330_v56, 1 }
  0x6d   : > { %v617_v32 = vpop.eup %616  ;;  %v338_v59 = vrot.slane %v337_v57, 1  ;;  %v332_v60 = vadd.f32 %v331_v58, %v330_v56 }
  0x6e   : > { %v281_v34 = vcombine.high %v617_v32, %v617_v32  ;;  %v283_v35 = vsel %vm258_vm0, %v617_v32, 0.0 }
  0x6f   : > { %v284_v36 = vrot.slane %v283_v35, 4  ;;  %v339_v63 = vadd.f32 %v338_v59, %v337_v57 }
  0x70   : > { %v290_v38 = vsel %vm258_vm0, %v281_v34, 0.0 }
  0x71   : > { %v285_v40 = vadd.f32 %v284_v36, %v283_v35  ;;  %v291_v41 = vrot.slane %v290_v38, 4 }
  0x73   : > { %v286_v43 = vrot.slane %v285_v40, 2  ;;  %v292_v44 = vadd.f32 %v291_v41, %v290_v38 }
  0x75   : > { %v287_v46 = vadd.f32 %v286_v43, %v285_v40  ;;  %v293_v47 = vrot.slane %v292_v44, 2 }
  0x77   : > { %v288_v49 = vrot.slane %v287_v46, 1  ;;  %v294_v50 = vadd.f32 %v293_v47, %v292_v44 }
  0x79   : > { %v289_v52 = vadd.f32 %v288_v49, %v287_v46  ;;  %v295_v53 = vrot.slane %v294_v50, 1 }
  0x7b   : > { %v296_v55 = vadd.f32 %v295_v53, %v294_v50  ;;  %618 = vlog2.f32 %v289_v52 }
  0x7d   : > { %620 = vlog2.f32 %v296_v55 }
  0x85   : > { %v619_v61 = vpop.eup %618 }
  0x86   : > { %v298_v62 = vmul.f32 0.6931472, %v619_v61 }
  0x87   : > { %v621_v1 = vpop.eup %620 }
  0x88   : > { %v300_v2 = vmul.f32 0.6931472, %v621_v1  ;;  %v340_v3 = vsub.f32 %v332_v60, %v298_v62 }
  0x8a   : > { %v341_v6 = vsub.f32 %v339_v63, %v300_v2  ;;  %v342_v7 = vmul.f32 1.442695, %v340_v3  ;;  %v373_v24 = vmul.f32 %v366_v16, %v340_v3 }
  0x8c   : > { %622 = vpow2.f32 %v342_v7  ;;  %v344_v10 = vmul.f32 1.442695, %v341_v6  ;;  %v374_v27 = vmul.f32 %v370_v19, %v341_v6 }
  0x8e   : > { %624 = vpow2.f32 %v344_v10 }
  0x96   : > { %v623_v17 = vpop.eup %622 }
  0x97   : > { %v375_v21 = vsub.f32 1.0, %v623_v17 }
  0x98   : > { %v625_v23 = vpop.eup %624 }
  0x99   : > { %v376_v25 = vsub.f32 1.0, %v625_v23  ;;  %v377_v26 = vmul.f32 %v375_v21, %v375_v21 }
  0x9b   : > { %v378_v28 = vmul.f32 %v376_v25, %v376_v25  ;;  %v379_v29 = vsub.f32 0.0, %v377_v26 }
  0x9d   : > { %v380_v30 = vsub.f32 0.0, %v378_v28  ;;  %v381_v18 = vmul.f32 %v379_v29, %v373_v24 }
  0x9f   : > { %v382_v31 = vmul.f32 %v380_v30, %v374_v27  ;;  %v386_v32 = vsel %vm385_vm7, %v381_v18, 0.0 }
  0xa1   : > { %v387_v20 = vsel %vm385_vm7, %v382_v31, 0.0 }
  0xa2   : > { %v388_v33 = vadd.f32 %v387_v20, %v386_v32 }
  0xa4   : > { %389 = vadd.xlane.f32.xlu0 %v388_v33 }
 0x131   : > { %v390_v14 = vpop.xlane.xlu0 %389 }
 0x132   : > { %v391_v22 = vrot.slane %v390_v14, 4 }
 0x134   : > { %v392_v34 = vadd.f32 %v391_v22, %v390_v14 }
 0x136   : > { %v393_v35 = vrot.slane %v392_v34, 2 }
 0x138   : > { %v394_v36 = vadd.f32 %v393_v35, %v392_v34 }
 0x13a   : > { %v395_v37 = vrot.slane %v394_v36, 1 }
 0x13c   : > { %v396_v38 = vadd.f32 %v395_v37, %v394_v36 }
 0x13e   : > { %540 = vpush %v396_v38 }
 0x16f   : > { %s541_s25 = spop %540 }
 0x170   : > { %v399_v40 = vstv %s541_s25 }
 0x171   : > { %v400_v41 = vsel %vm398_vm8, %v399_v40, 0.0 }
 0x172   : > { %401 = vst [vmem:[%s241_s18] sm:$0x1] %v400_v41 }
 0x173   : > { %684 = shalt.err (!%p681_p3)
}
 0x174   : > { %s685_s30 = scalar_lea.hbm %s970_s6, 16  ;;  %s689_s28 = scalar_lea.hbm %s1022_s3, 32 }
 0x175   : > { %p686_p7 = scmp.ne.s32.totalorder %s970_s6, %s685_s30  ;;  %p690_p1 = scmp.lt.u32.totalorder %s970_s6, %s1022_s3 }
 0x176   : > { %p691_p0 = scmp.lt.u32.totalorder %s689_s28, %s685_s30  ;;  %p693_p2 = scmp.lt.u32.totalorder %s685_s30, %s970_s6 }
 0x177   : > { %p687_p10 = pnand %p686_p7, %p1037_p12 }
 0x178   : > { %p692_p8 = por %p691_p0, %p690_p1 }
 0x179   : > { %p688_p6 = pneg %p687_p10 }
 0x17a   : > { %p694_p5 = por %p693_p2, %p692_p8 }
 0x17c   : > { %p695_p4 = pnand %p694_p5, %p688_p6 }
 0x17e   : > { %698 = shalt.err (!%p695_p4)
}
 0x17f   : > { %548 = dma.vmem_to_hbm [thread:$0]  (%p1037_p12), %s972_s19, 16, %s970_s6, %s403_s27  }
 0x180 PF: > { %s428_s8 = sand.u32 1, %s737_s12   ;;  %p1038_p9 = scmp.ne.s32.totalorder %s1030_s23, 0 }
 0x181   : > { %p1039_p13 = scmp.ge.s32.totalorder %s757_s17, 2  ;;  %s429_s18 = scalar_lea.sflag [#allocation4], %s428_s8 }
 0x183   : > { %p559_p11 = pnand %p1039_p13, %p1038_p9 }
 0x185   : > { %732 = dma.done.wait (!%p559_p11), %s429_s18, 16  }
 0x186   : > { %734 = vsyncadd (!%p559_p11), %s429_s18, 4294967280  ;;  %s20_s17 = sadd.s32 1, %s757_s17   ;;  %s1040_s12 = smov %s741_s13 }
 0x187   : > { %p17_p3 = scmp.ge.s32.totalorder %s20_s17, 4   ;;  %s1041_s13 = smov %s745_s14 }
 0x188   : > { %s1042_s14 = smov %s874_s9  ;;  %s1043_s15 = smov %s753_s16 }
 0x189   : > { %s1044_s16 = smov %s1046_s29  ;;  %19 = sbr.rel (!%p17_p3) target bundleno = 7 (0x7), region = 85 }
 0x190   :  { %433 = vsyncpa [#allocation3], 1 }
 0x191   :  { %435 = vsyncpa [#allocation3 + $0x1], 1 }
 0x192   :  { %436 = vsyncpa [#allocation4], 1 }
 0x193   :  { %438 = vsyncpa [#allocation4 + $0x1], 1 }
 0x194   :  { %439 = vsyncpa [#allocation5], 1 }
 0x195   :  { %441 = vsyncpa [#allocation5 + $0x1], 1 }

</bundles_post_ra>
